<compile_context>
chip_gen: v7x
topology: tpu7x:2x2x1
jax: 0.10.0
libtpu: 0.0.40
codegen_flags: <defaults>
</compile_context>

<pallas_src>
import jax
import jax.numpy as jnp
from jax.experimental import pallas as pl
from jax.experimental.pallas import tpu as pltpu


# ----------------------------- Pallas kernel ------------------------------ #

def attention_kernel(vt_ref, wt_ref, bt_ref, out_ref):
    # vt_ref : [v_size, TB]  f32  (streamed activation tile; batch on lanes)
    # wt_ref : [hid, v_size] f32  (folded weight^T, VMEM-resident)
    # bt_ref : [hid, 1]      f32  (folded bias^T,   VMEM-resident)
    # out_ref: [hid, TB]     f32  (lane-dense: last dim = batch tile)
    out_ref[...] = jnp.dot(wt_ref[...], vt_ref[...],
                           preferred_element_type=jnp.float32) + bt_ref[...]


# ------------------------------- wrapper ----------------------------------- #

def fold_params(params):
    """Host-side, one-time algebraic fold (eval mode, seq_len == 1):
         out = v @ (Wv@Wf) + (bv@Wf + bf)
       stored transposed so the kernel computes out_T = W1_T @ v_T + b1_T."""
    w1 = params["wv"] @ params["wf"]                      # [v_size, hid]  f32
    b1 = params["bv"] @ params["wf"] + params["bf"]       # [1, hid]       f32
    return {"w1_t": jnp.asarray(w1.T, jnp.float32),       # [hid, v_size]
            "b1_t": jnp.asarray(b1.T, jnp.float32)}       # [hid, 1]


def attention_pallas(q, k, v, folded, *, hid, block_b=2048):
    """Forward pass of the PyTorch `Attention` module (eval mode).

    q and k are accepted for API fidelity with the PyTorch module, but with
    seq_len == 1 the softmax over the single key is identically 1, so they
    are mathematically dead and are never DMA'd into the kernel.
    """
    del q, k
    B, v_size = v.shape

    # Tile selection (review):
    #  * B <= block_b  -> single grid step: whole problem in one VMEM block.
    #  * larger B      -> fixed tb = block_b tiles; pad batch so every tile is
    #    full (bounds VMEM on v7x's 64 MiB; no tb=B fallback) and make the
    #    grid even so "parallel" shards across both v7x TensorCores.
    if B <= block_b:
        tb, n_tiles = B, 1
    else:
        tb = block_b
        n_tiles = pl.cdiv(B, tb)
        n_tiles += n_tiles % 2                 # even grid -> both v7x TCs busy
    Bp = tb * n_tiles

    v_t = v.T                                  # [v_size, B]; batch on lanes
    if Bp != B:
        v_t = jnp.pad(v_t, ((0, 0), (0, Bp - B)))

    cost = pl.CostEstimate(
        flops=2 * Bp * v_size * hid,
        transcendentals=0,
        bytes_accessed=4 * (Bp * v_size + Bp * hid + hid * v_size + hid),
    )

    out_t = pl.pallas_call(
        attention_kernel,
        out_shape=jax.ShapeDtypeStruct((hid, Bp), jnp.float32),
        grid=(n_tiles,),
        in_specs=[
            pl.BlockSpec((v_size, tb), lambda i: (0, i)),   # activations stream
            pl.BlockSpec((hid, v_size), lambda i: (0, 0)),  # weight VMEM-resident
            pl.BlockSpec((hid, 1), lambda i: (0, 0)),       # bias VMEM-resident
        ],
        out_specs=pl.BlockSpec((hid, tb), lambda i: (0, i)),  # lane-dense stores
        compiler_params=pltpu.CompilerParams(
            dimension_semantics=("parallel",)),              # megacore on v7x
        cost_estimate=cost,
    )(v_t, folded["w1_t"], folded["b1_t"])

    return out_t[:, :B].T                      # [B, hid], module output layout


# ----------------------- params & pure-JAX reference ----------------------- #

def init_params(key, q_size, k_size, v_size, hid):
    """nn.Linear-style init (U(-1/sqrt(in), 1/sqrt(in))); weights stored as
    [in_features, hid] (pre-transposed for x @ W)."""
    keys = jax.random.split(key, 8)

    def linear(kw, kb, in_f, out_f):
        bound = 1.0 / jnp.sqrt(jnp.float32(in_f))
        w = jax.random.uniform(kw, (in_f, out_f), jnp.float32, -bound, bound)
        b = jax.random.uniform(kb, (1, out_f), jnp.float32, -bound, bound)
        return w, b

    wq, bq = linear(keys[0], keys[1], q_size, hid)
    wk, bk = linear(keys[2], keys[3], k_size, hid)
    wv, bv = linear(keys[4], keys[5], v_size, hid)
    wf, bf = linear(keys[6], keys[7], hid, hid)
    return dict(wq=wq, bq=bq, wk=wk, bk=bk, wv=wv, bv=bv, wf=wf, bf=bf)


def attention_ref(q, k, v, params, *, hid):
    """Faithful pure-JAX mirror of the PyTorch forward (eval mode), f32."""
    Q = q @ params["wq"] + params["bq"]
    K = k @ params["wk"] + params["bk"]
    V = v @ params["wv"] + params["bv"]
    B = q.shape[0]
    Q3 = Q.reshape(B, 1, hid)
    K3 = K.reshape(B, 1, hid)
    V3 = V.reshape(B, 1, hid)
    scale = hid ** -0.5
    attn = jnp.einsum("bqd,bkd->bqk", Q3, K3) * scale
    attn = jax.nn.softmax(attn, axis=-1)
    context = jnp.einsum("bqk,bkd->bqd", attn, V3).reshape(B, hid)
    return context @ params["wf"] + params["bf"]        # dropout == identity (eval)


# ---------------------------------- main ----------------------------------- #

if __name__ == "__main__":
    # Many rows per pallas_call (fixed overhead amortized); feature sizes
    # stay small, matching the module.
    B = 256
    q_size, k_size, v_size, hid = 16, 16, 16, 32

    key = jax.random.PRNGKey(0)
    k_q, k_k, k_v, k_param = jax.random.split(key, 4)
    q = jax.random.normal(k_q, (B, q_size), jnp.float32)
    k = jax.random.normal(k_k, (B, k_size), jnp.float32)
    v = jax.random.normal(k_v, (B, v_size), jnp.float32)

    params = init_params(k_param, q_size, k_size, v_size, hid)
    folded = fold_params(params)

    out = attention_pallas(q, k, v, folded, hid=hid)
    out = jax.block_until_ready(out)

    ref = attention_ref(q, k, v, params, hid=hid)
    assert out.shape == (B, hid)
    # Full-f32 kernel vs differently-associated f32 reference: error ~1e-6;
    # tolerance kept conservative against any reduced-precision MXU default.
    assert jnp.allclose(out, ref, atol=1e-2, rtol=1e-2), "mismatch vs JAX reference"

    print("KERNEL_OK")
</pallas_src>

<mosaic_0001>
module attributes {stable_mosaic.version = 11 : i64} {
  func.func @attention_kernel(%arg0: i32, %arg1: memref<16x256xf32, #tpu.memory_space<vmem>>, %arg2: memref<32x16xf32, #tpu.memory_space<vmem>>, %arg3: memref<32x1xf32, #tpu.memory_space<vmem>>, %arg4: memref<32x256xf32, #tpu.memory_space<vmem>>) attributes {dimension_semantics = [#tpu.dimension_semantics<parallel>], iteration_bounds = array<i64: 1>, scalar_prefetch = 0 : i64, scratch_operands = 0 : i64, tpu.core_type = #tpu.core_type<tc>, window_params = [{transform_indices = @transform_0, window_bounds = array<i64: 16, 256>}, {pipeline_mode = #tpu.pipeline_mode<synchronous>, transform_indices = @transform_1, window_bounds = array<i64: 32, 16>}, {pipeline_mode = #tpu.pipeline_mode<synchronous>, transform_indices = @transform_2, window_bounds = array<i64: 32, 1>}, {transform_indices = @transform_3, window_bounds = array<i64: 32, 256>}]} {
    %c0 = arith.constant 0 : index
    %c0_0 = arith.constant 0 : index
    %0 = vector.load %arg2[%c0, %c0_0] : memref<32x16xf32, #tpu.memory_space<vmem>>, vector<32x16xf32>
    %c0_1 = arith.constant 0 : index
    %c0_2 = arith.constant 0 : index
    %1 = vector.load %arg1[%c0_1, %c0_2] : memref<16x256xf32, #tpu.memory_space<vmem>>, vector<16x256xf32>
    %cst = arith.constant dense<0.000000e+00> : vector<32x256xf32>
    %2 = tpu.matmul %0, %1, %cst {dimension_numbers = #tpu.dot_dimension_numbers<[1], [0], [0], [1], [0, 0, 1, 1], [], []>} : vector<32x16xf32>, vector<16x256xf32>, vector<32x256xf32> -> vector<32x256xf32>
    %c0_3 = arith.constant 0 : index
    %c0_4 = arith.constant 0 : index
    %3 = vector.load %arg3[%c0_3, %c0_4] : memref<32x1xf32, #tpu.memory_space<vmem>>, vector<32x1xf32>
    %4 = vector.broadcast %3 : vector<32x1xf32> to vector<32x256xf32>
    %5 = arith.addf %2, %4 : vector<32x256xf32>
    %c0_5 = arith.constant 0 : index
    %c0_6 = arith.constant 0 : index
    %6 = vector.load %arg4[%c0_5, %c0_6] : memref<32x256xf32, #tpu.memory_space<vmem>>, vector<32x256xf32>
    tpu.vector_store %arg4[%c0_5, %c0_6], %5 {strides = array<i32>} : memref<32x256xf32, #tpu.memory_space<vmem>>, vector<32x256xf32>,
    return
  }
  func.func @transform_0(%arg0: i32) -> (i32, i32) {
    %c0_i32 = arith.constant 0 : i32
    %c0_i32_0 = arith.constant 0 : i32
    return %c0_i32, %arg0 : i32, i32
  }
  func.func @transform_1(%arg0: i32) -> (i32, i32) {
    %c0_i32 = arith.constant 0 : i32
    %c0_i32_0 = arith.constant 0 : i32
    %c0_i32_1 = arith.constant 0 : i32
    return %c0_i32, %c0_i32_0 : i32, i32
  }
  func.func @transform_2(%arg0: i32) -> (i32, i32) {
    %c0_i32 = arith.constant 0 : i32
    %c0_i32_0 = arith.constant 0 : i32
    %c0_i32_1 = arith.constant 0 : i32
    return %c0_i32, %c0_i32_0 : i32, i32
  }
  func.func @transform_3(%arg0: i32) -> (i32, i32) {
    %c0_i32 = arith.constant 0 : i32
    %c0_i32_0 = arith.constant 0 : i32
    return %c0_i32, %arg0 : i32, i32
  }
}

</mosaic_0001>

<bundles_post_ra>
// kernel: tpu_custom_call.1
= control target key start
LH: loop header
LB: loop body
LE: loop exit
PB: predicated region body
PF: predicated region fallthrough
CT: control target
= control target key end

     0   :  { %v214_v5 = vmov 0.0   ;;  %v215_v7 = vmov 0   ;;  %vm47_vm0 = vcmask 130048   ;;  %s291_s0 = inlined_call_operand.vmem [shape: f32[16,256], index: 0, kind: input, shape index: {}]   ;;  %s292_s1 = inlined_call_operand.vmem [shape: f32[32,16], index: 1, kind: input, shape index: {}]   ;;  %s293_s2 = inlined_call_operand.vmem [shape: f32[32,1], index: 2, kind: input, shape index: {}]   ;;  %s294_s3 = inlined_call_operand.hbm [shape: f32[32,256], index: 3, kind: output, shape index: {}]  }
   0x1   :  { %v20_v0 = vld [vmem:[%s291_s0 + $0x8] sm:$0xff]  ;;  %v22_v1 = vld [vmem:[%s291_s0 + $0x18] sm:$0xff]  ;;  %v19_v2 = vld [vmem:[%s291_s0] sm:$0xff]  ;;  %124 = vmatprep.mubr.f32.mxu0 %v214_v5  ;;  %136 = vmatprep.mubr.f32.mxu1 %v214_v5 }
   0x2   :  { %v177_v3 = vpack.c.bf16 %v22_v1, %v20_v0  ;;  %v21_v4 = vld [vmem:[%s291_s0 + $0x10] sm:$0xff]  ;;  %189 = vset.pattern.permute.xlu1 %v215_v7  ;;  %188 = vset.pattern.permute.xlu0 %v215_v7  ;;  %v23_v9 = vld [vmem:[%s293_s2] sm:$0xff] }
   0x3   :  { %v179_v6 = vpack.c.bf16 %v21_v4, %v19_v2  ;;  %v25_v8 = vld [vmem:[%s293_s2 + $0x10] sm:$0xff]  ;;  %v15_v10 = vld [vmem:[%s292_s1] sm:$0xff] }
   0x4   :  { %178 = vmatprep.subr.bf16.mxu0 %v177_v3  ;;  %181 = vmatprep.subr.bf16.mxu1 %v177_v3  ;;  %v17_v11 = vld [vmem:[%s292_s1 + $0x10] sm:$0xff] }
   0x5   :  { %180 = vmatpush1.bf16.msra.mxu0 %v179_v6  ;;  %182 = vmatpush1.bf16.msra.mxu1 %v179_v6 }
   0x6   :  { %8 = vsyncpa [#allocation3], 0  ;;  %39 = vperm.xlu1 %189, %v25_v8   ;;  %29 = vperm.xlu0 %188, %v23_v9   ;;  %v26_v12 = vld [vmem:[%s293_s2 + $0x18] sm:$0xff]  ;;  %v24_v13 = vld [vmem:[%s293_s2 + $0x8] sm:$0xff]  ;;  %s216_s2 = smov [#allocation2]  }
   0x7   :  { %v16_v14 = vld [vmem:[%s292_s1 + $0x8] sm:$0xff]  ;;  %v18_v15 = vld [vmem:[%s292_s1 + $0x18] sm:$0xff]  ;;  %s162_s8 = sshll.u32 %s216_s2, 4  ;;  %s163_s8 = int_to_ptr.vmem [resolvable:$true] %s162_s8 }
   0x8   :  { %173 = vmatmul.mubr.msk.f32.vlgmr.msra.gmra.mrb[0].mxu0 %vm47_vm0, %v15_v10  ;;  %175 = vmatmul.mubr.msk.f32.vlgmr.msra.gmra.mrb[0].mxu1 %vm47_vm0, %v17_v11  ;;  %s190_s1 = scalar_lea.vmem %s163_s8, 1024  ;;  %p195_p1 = scmp.lt.s32.totalorder %s163_s8, %s163_s8 }
   0x9   :  { %130 = vmatprep.mubr.f32.mxu0 %v214_v5  ;;  %142 = vmatprep.mubr.f32.mxu1 %v214_v5  ;;  %p191_p0 = scmp.ne.s32.totalorder %s163_s8, %s190_s1  ;;  %p196_p2 = scmp.lt.s32.totalorder %s190_s1, %s190_s1 }
   0xa   :  { %44 = vperm.xlu1 %189, %v26_v12   ;;  %34 = vperm.xlu0 %188, %v24_v13  }
   0xb   :  { %p197_p3 = por %p196_p2, %p195_p1 }
   0xc   :  { %174 = vmatmul.mubr.msk.f32.gmra.mrb[2].mxu0 %vm47_vm0, %v16_v14  ;;  %176 = vmatmul.mubr.msk.f32.gmra.mrb[2].mxu1 %vm47_vm0, %v18_v15 }
   0xd   :  { %p198_p4 = pnand %p197_p3, %p191_p0 }
  0x85   :  { %v40_v16 = vpop.permute.xlu1 %39  ;;  %v30_v17 = vpop.permute.xlu0 %29 }
  0x89   :  { %v45_v26 = vpop.permute.xlu1 %44  ;;  %v35_v27 = vpop.permute.xlu0 %34 }
  0xdb   :  { %v126_v18 = vpop.f32.mrb[0].mxu0  ;;  %v138_v19 = vpop.f32.mrb[0].mxu1 }
  0xdc   :  { %v127_v20 = vadd.f32 %v126_v18, %v30_v17  ;;  %v139_v21 = vadd.f32 %v138_v19, %v40_v16  ;;  %v128_v22 = vpop.f32.mrb[1].mxu0  ;;  %v140_v23 = vpop.f32.mrb[1].mxu1 }
  0xdd   :  { %v129_v24 = vadd.f32 %v128_v22, %v30_v17  ;;  %v141_v25 = vadd.f32 %v140_v23, %v40_v16 }
  0xde   :  { %149 = vst [vmem:[#allocation2] sm:$0xff] %v127_v20  ;;  %153 = vst [vmem:[#allocation2 + $0x20] sm:$0xff] %v139_v21 }
  0xdf   :  { %150 = vst [vmem:[#allocation2 + $0x8] sm:$0xff] %v129_v24  ;;  %154 = vst [vmem:[#allocation2 + $0x28] sm:$0xff] %v141_v25  ;;  %v132_v28 = vpop.f32.mrb[2].mxu0  ;;  %v144_v29 = vpop.f32.mrb[2].mxu1 }
  0xe0   :  { %v133_v30 = vadd.f32 %v132_v28, %v35_v27  ;;  %v145_v31 = vadd.f32 %v144_v29, %v45_v26  ;;  %v134_v32 = vpop.f32.mrb[3].mxu0  ;;  %v146_v33 = vpop.f32.mrb[3].mxu1 }
  0xe1   :  { %v135_v34 = vadd.f32 %v134_v32, %v35_v27  ;;  %v147_v35 = vadd.f32 %v146_v33, %v45_v26 }
  0xe2   :  { %151 = vst [vmem:[#allocation2 + $0x10] sm:$0xff] %v133_v30  ;;  %155 = vst [vmem:[#allocation2 + $0x30] sm:$0xff] %v145_v31 }
  0xe3   :  { %152 = vst [vmem:[#allocation2 + $0x18] sm:$0xff] %v135_v34  ;;  %156 = vst [vmem:[#allocation2 + $0x38] sm:$0xff] %v147_v35 }
  0xe4   :  { %201 = shalt.err (!%p198_p4)
}
  0xe5   :  { %s202_s11 = scalar_lea.hbm %s294_s3, 1024 }
  0xe6   :  { %p203_p5 = scmp.ne.s32.totalorder %s294_s3, %s202_s11  ;;  %p206_p6 = scmp.lt.u32.totalorder %s202_s11, %s294_s3 }
  0xe8   :  { %p208_p7 = pnand %p206_p6, %p203_p5 }
  0xea   :  { %211 = shalt.err (!%p208_p7)
}
  0xeb   :  { %s217_s16 = smov 256   ;;  %s218_s17 = smov 16  }
  0xec   :  { %168 = dma.vmem_to_hbm [thread:$0]  %s163_s8, 1024, %s294_s3, [#allocation3], %s217_s16, %s217_s16, %s218_s17  }
  0xed   :  { %212 = dma.done.wait [#allocation3], 1024  }
  0xee   :  { %213 = vsyncadd [#allocation3], 4294966272 }
  0xef   :  { %172 = vsyncpa [#allocation3], 1 }

</bundles_post_ra>
